<compile_context>
chip_gen: v6e
topology: v6e:2x2x1
jax: 0.10.0
libtpu: 0.0.40
codegen_flags: <defaults>
</compile_context>

<pallas_src>
import functools

import jax
import jax.numpy as jnp
import numpy as np
from jax import lax
from jax.experimental import pallas as pl
from jax.experimental.pallas import tpu as pltpu

_SUBLANE = 8
_LANE = 128


def _round_up(a, b):
    return ((a + b - 1) // b) * b


def _label_smoothing_kernel(x_ref, tgt_ref, out_ref, *, size, padding_idx,
                            smoothing, confidence, n_valid, block_rows):
    x = x_ref[...]                              # (bn, V) input dtype
    tgt = tgt_ref[...]                          # (bn, 1) int32
    bn, V = x.shape
    f32 = jnp.float32

    # Per-row reductions; each is one fused streaming pass over the x tile.
    m = jnp.max(x, axis=1, keepdims=True).astype(f32)                  # (bn,1)
    sum_x = jnp.sum(x.astype(f32), axis=1, keepdims=True)              # (bn,1)
    cols = lax.broadcasted_iota(jnp.int32, (bn, V), 1)
    x_tgt = jnp.sum(jnp.where(cols == tgt, x.astype(f32), 0.0),
                    axis=1, keepdims=True)                             # (bn,1)
    x_pad = x[:, padding_idx:padding_idx + 1].astype(f32)              # (bn,1)
    lse = jnp.log(jnp.sum(jnp.exp(x.astype(f32) - m),
                          axis=1, keepdims=True))                      # (bn,1)

    base = smoothing / (size - 2)
    logp_sum = sum_x - float(V) * (m + lse)     # sum_c log_softmax(x)[c]
    logp_tgt = x_tgt - m - lse
    logp_pad = x_pad - m - lse
    row_loss = -(base * logp_sum
                 + (confidence - base) * logp_tgt
                 - base * logp_pad)

    # Zero pad-target rows AND tail rows past the true row count (the last
    # block's x tile beyond n_valid holds unspecified data from the clamped
    # boundary DMA; jnp.where safely discards any NaN/Inf it may produce).
    row0 = pl.program_id(0) * block_rows
    row_idx = row0 + lax.broadcasted_iota(jnp.int32, (bn, 1), 0)
    keep = jnp.logical_and(row_idx < n_valid, tgt != padding_idx)
    row_loss = jnp.where(keep, row_loss, 0.0)

    partial = jnp.sum(row_loss, keepdims=True)                         # (1,1)
    # lane-dense, unmasked store of this block's partial sum
    out_ref[...] = jnp.broadcast_to(partial, out_ref.shape).astype(out_ref.dtype)


def _vmem_capacity_bytes():
    try:
        info = pltpu.get_tpu_info()
        cap = getattr(info, "vmem_capacity_bytes", None)
        if cap:
            return int(cap)
    except Exception:
        pass
    return 64 * 1024 * 1024   # conservative: v7x per-TensorCore VMEM


def _pick_block_rows(n_rows, vocab, x_itemsize, tile_budget):
    # double-buffered input tile + ~2 f32-wide streaming intermediates per row
    bytes_per_row = 2 * vocab * x_itemsize + 2 * vocab * 4
    cap = max(_SUBLANE, tile_budget // bytes_per_row)
    cap = int(min(cap, 1024))
    mult = 16 if x_itemsize == 2 else _SUBLANE      # bf16 sublane packing
    cap = max(_SUBLANE, (cap // mult) * mult)
    if n_rows > _SUBLANE:
        # keep >= 2 grid steps so both v7x TensorCores get work
        cap = min(cap, _round_up((n_rows + 1) // 2, _SUBLANE))
    rows_rounded = _round_up(n_rows, _SUBLANE)
    return max(_SUBLANE, min(cap, rows_rounded))


def label_smoothing_loss(x, target, *, size, padding_idx, smoothing,
                         block_rows=None):
    N, V = x.shape
    assert V == size
    assert size > 2, "smoothing/(size-2) is undefined for size <= 2"
    confidence = 1.0 - smoothing
    itemsize = jnp.dtype(x.dtype).itemsize

    vmem_cap = _vmem_capacity_bytes()
    if vmem_cap >= 100 * 1024 * 1024:        # v5e / v6e: 128 MiB physical VMEM
        tile_budget = 44 * 1024 * 1024
    else:                                     # v7x: 64 MiB per TensorCore
        tile_budget = 24 * 1024 * 1024
    tile_budget = min(tile_budget, vmem_cap - 12 * 1024 * 1024)

    if block_rows is None:
        block_rows = _pick_block_rows(N, V, itemsize, tile_budget)

    num_blocks = (N + block_rows - 1) // block_rows
    n_pad = num_blocks * block_rows

    # Only the tiny target array is padded (padding_idx rows contribute 0);
    # the (N, V) logits are passed through untouched -- the boundary block is
    # a clamped DMA and tail rows are masked in-kernel against the true N.
    tgt2d = target.reshape(N, 1).astype(jnp.int32)
    if n_pad != N:
        tgt2d = jnp.pad(tgt2d, ((0, n_pad - N), (0, 0)),
                        constant_values=padding_idx)

    # TODO(synk): for very large vocabularies (V >~ 128k-256k) add a second
    # grid axis over V ("arbitrary", last) with online running max/logsumexp
    # and running sum_x/x_tgt in VMEM scratch so row tiles stay large.

    bytes_per_row = 2 * V * itemsize + 2 * V * 4
    need = block_rows * bytes_per_row + (4 << 20)
    vmem_limit = int(min(max(need, 32 * 1024 * 1024),
                         vmem_cap - 8 * 1024 * 1024))

    kernel = functools.partial(
        _label_smoothing_kernel, size=size, padding_idx=padding_idx,
        smoothing=float(smoothing), confidence=float(confidence),
        n_valid=N, block_rows=block_rows)

    partials = pl.pallas_call(
        kernel,
        out_shape=jax.ShapeDtypeStruct((num_blocks * _SUBLANE, _LANE),
                                       jnp.float32),
        grid_spec=pltpu.PrefetchScalarGridSpec(
            num_scalar_prefetch=0,
            grid=(num_blocks,),
            in_specs=[
                pl.BlockSpec((block_rows, V), lambda i: (i, 0)),
                pl.BlockSpec((block_rows, 1), lambda i: (i, 0)),
            ],
            out_specs=pl.BlockSpec((_SUBLANE, _LANE), lambda i: (i, 0)),
        ),
        compiler_params=pltpu.CompilerParams(
            dimension_semantics=("parallel",),
            vmem_limit_bytes=vmem_limit),
    )(x, tgt2d)

    # Each block broadcasts its partial across its (8, 128) tile; read one
    # copy per block and reduce in the wrapper (keeps the grid axis parallel).
    total = jnp.sum(partials.reshape(num_blocks, _SUBLANE, _LANE)[:, 0, 0])
    # CrossEntropyLoss(reduction='mean') with probability targets: average
    # over all N rows (pad-target rows contribute 0 but count in the mean).
    return total / N


def _reference_loss(x, target, *, size, padding_idx, smoothing):
    x = x.astype(jnp.float32)
    N, V = x.shape
    confidence = 1.0 - smoothing
    base = smoothing / (size - 2)
    logp = jax.nn.log_softmax(x, axis=-1)
    td = jnp.full((N, V), base, jnp.float32)
    td = td.at[jnp.arange(N), target].set(confidence)
    td = td.at[:, padding_idx].set(0.0)
    td = jnp.where((target == padding_idx)[:, None], 0.0, td)
    return jnp.mean(-jnp.sum(td * logp, axis=-1))


if __name__ == "__main__":
    # small shapes consistent with the module: N tokens, `size` classes
    N, size = 10, 32
    padding_idx = 0
    smoothing = 0.1

    key = jax.random.PRNGKey(0)
    kx, kt = jax.random.split(key)
    x = jax.random.normal(kx, (N, size), dtype=jnp.float32)        # logits
    target = jax.random.randint(kt, (N,), 0, size, dtype=jnp.int32)
    target = target.at[3].set(padding_idx)   # exercise pad-row masking

    loss = label_smoothing_loss(
        x, target, size=size, padding_idx=padding_idx, smoothing=smoothing)
    jax.block_until_ready(loss)

    ref = _reference_loss(x, target, size=size, padding_idx=padding_idx,
                          smoothing=smoothing)
    if not np.allclose(np.asarray(loss), np.asarray(ref), rtol=1e-5, atol=1e-5):
        raise AssertionError(f"mismatch: kernel={loss} ref={ref}")
    print("KERNEL_OK")
</pallas_src>

<mosaic_0001>
module attributes {stable_mosaic.version = 11 : i64} {
  func.func @_label_smoothing_kernel(%arg0: i32, %arg1: memref<8x32xf32, #tpu.memory_space<vmem>>, %arg2: memref<8x1xi32, #tpu.memory_space<vmem>>, %arg3: memref<8x128xf32, #tpu.memory_space<vmem>>) attributes {dimension_semantics = [#tpu.dimension_semantics<parallel>], iteration_bounds = array<i64: 2>, scalar_prefetch = 0 : i64, scratch_operands = 0 : i64, tpu.core_type = #tpu.core_type<tc>, window_params = [{transform_indices = @transform_0, window_bounds = array<i64: 8, 32>}, {transform_indices = @transform_1, window_bounds = array<i64: 8, 1>}, {transform_indices = @transform_2, window_bounds = array<i64: 8, 128>}]} {
    %c0 = arith.constant 0 : index
    %c0_0 = arith.constant 0 : index
    %0 = vector.load %arg1[%c0, %c0_0] : memref<8x32xf32, #tpu.memory_space<vmem>>, vector<8x32xf32>
    %c0_1 = arith.constant 0 : index
    %c0_2 = arith.constant 0 : index
    %1 = vector.load %arg2[%c0_1, %c0_2] : memref<8x1xi32, #tpu.memory_space<vmem>>, vector<8x1xi32>
    %cst = arith.constant dense<0xFF800000> : vector<8xf32>
    %2 = vector.multi_reduction <maximumf>, %0, %cst [1] : vector<8x32xf32> to vector<8xf32>
    %3 = vector.shape_cast %2 : vector<8xf32> to vector<8x1xf32>
    %cst_3 = arith.constant dense<0.000000e+00> : vector<8xf32>
    %4 = vector.multi_reduction <add>, %0, %cst_3 [1] : vector<8x32xf32> to vector<8xf32>
    %5 = vector.shape_cast %4 : vector<8xf32> to vector<8x1xf32>
    %6 = tpu.iota {dimensions = array<i32: 1>} : vector<8x32xi32>
    %7 = vector.broadcast %1 : vector<8x1xi32> to vector<8x32xi32>
    %8 = arith.cmpi eq, %6, %7 : vector<8x32xi32>
    %cst_4 = arith.constant 0.000000e+00 : f32
    %9 = vector.broadcast %cst_4 : f32 to vector<8x32xf32>
    %10 = arith.select %8, %0, %9 : vector<8x32xi1>, vector<8x32xf32>
    %cst_5 = arith.constant dense<0.000000e+00> : vector<8xf32>
    %11 = vector.multi_reduction <add>, %10, %cst_5 [1] : vector<8x32xf32> to vector<8xf32>
    %12 = vector.shape_cast %11 : vector<8xf32> to vector<8x1xf32>
    %13 = vector.extract_strided_slice %0 {offsets = [0, 0], sizes = [8, 1], strides = [1, 1]} : vector<8x32xf32> to vector<8x1xf32>
    %14 = vector.broadcast %3 : vector<8x1xf32> to vector<8x32xf32>
    %15 = arith.subf %0, %14 : vector<8x32xf32>
    %16 = math.exp %15 : vector<8x32xf32>
    %cst_6 = arith.constant dense<0.000000e+00> : vector<8xf32>
    %17 = vector.multi_reduction <add>, %16, %cst_6 [1] : vector<8x32xf32> to vector<8xf32>
    %18 = vector.shape_cast %17 : vector<8xf32> to vector<8x1xf32>
    %19 = math.log %18 : vector<8x1xf32>
    %20 = arith.addf %3, %19 : vector<8x1xf32>
    %cst_7 = arith.constant 3.200000e+01 : f32
    %21 = vector.broadcast %cst_7 : f32 to vector<8x1xf32>
    %22 = arith.mulf %21, %20 : vector<8x1xf32>
    %23 = arith.subf %5, %22 : vector<8x1xf32>
    %24 = arith.subf %12, %3 : vector<8x1xf32>
    %25 = arith.subf %24, %19 : vector<8x1xf32>
    %26 = arith.subf %13, %3 : vector<8x1xf32>
    %27 = arith.subf %26, %19 : vector<8x1xf32>
    %cst_8 = arith.constant 0.00333333341 : f32
    %28 = vector.broadcast %cst_8 : f32 to vector<8x1xf32>
    %29 = arith.mulf %28, %23 : vector<8x1xf32>
    %cst_9 = arith.constant 0.896666646 : f32
    %30 = vector.broadcast %cst_9 : f32 to vector<8x1xf32>
    %31 = arith.mulf %30, %25 : vector<8x1xf32>
    %32 = arith.addf %29, %31 : vector<8x1xf32>
    %cst_10 = arith.constant 0.00333333341 : f32
    %33 = vector.broadcast %cst_10 : f32 to vector<8x1xf32>
    %34 = arith.mulf %33, %27 : vector<8x1xf32>
    %35 = arith.subf %32, %34 : vector<8x1xf32>
    %cst_11 = arith.constant 0.000000e+00 : f32
    %36 = vector.broadcast %cst_11 : f32 to vector<8x1xf32>
    %37 = arith.subf %36, %35 : vector<8x1xf32>
    %c8_i32 = arith.constant 8 : i32
    %38 = arith.muli %arg0, %c8_i32 : i32
    %39 = tpu.iota {dimensions = array<i32: 0>} : vector<8x1xi32>
    %40 = vector.broadcast %38 : i32 to vector<8x1xi32>
    %41 = arith.addi %40, %39 : vector<8x1xi32>
    %c10_i32 = arith.constant 10 : i32
    %42 = vector.broadcast %c10_i32 : i32 to vector<8x1xi32>
    %43 = arith.cmpi slt, %41, %42 : vector<8x1xi32>
    %c0_i32 = arith.constant 0 : i32
    %44 = vector.broadcast %c0_i32 : i32 to vector<8x1xi32>
    %45 = arith.cmpi ne, %1, %44 : vector<8x1xi32>
    %46 = arith.andi %43, %45 : vector<8x1xi1>
    %cst_12 = arith.constant 0.000000e+00 : f32
    %47 = vector.broadcast %cst_12 : f32 to vector<8x1xf32>
    %48 = arith.select %46, %37, %47 : vector<8x1xi1>, vector<8x1xf32>
    %49 = vector.shape_cast %48 : vector<8x1xf32> to vector<1x8x1xf32>
    %cst_13 = arith.constant dense<0.000000e+00> : vector<1xf32>
    %50 = vector.multi_reduction <add>, %49, %cst_13 [1, 2] : vector<1x8x1xf32> to vector<1xf32>
    %51 = vector.shape_cast %50 : vector<1xf32> to vector<1x1x1xf32>
    %52 = vector.extract %51[0, 0, 0] : f32 from vector<1x1x1xf32>
    %53 = vector.broadcast %52 : f32 to vector<1x1xf32>
    %54 = vector.shape_cast %53 : vector<1x1xf32> to vector<1x1xf32>
    %55 = vector.broadcast %54 : vector<1x1xf32> to vector<8x128xf32>
    %c0_14 = arith.constant 0 : index
    %c0_15 = arith.constant 0 : index
    %56 = vector.load %arg3[%c0_14, %c0_15] : memref<8x128xf32, #tpu.memory_space<vmem>>, vector<8x128xf32>
    tpu.vector_store %arg3[%c0_14, %c0_15], %55 {strides = array<i32>} : memref<8x128xf32, #tpu.memory_space<vmem>>, vector<8x128xf32>,
    return
  }
  func.func @transform_0(%arg0: i32) -> (i32, i32) {
    %c0_i32 = arith.constant 0 : i32
    %c0_i32_0 = arith.constant 0 : i32
    return %arg0, %c0_i32 : i32, i32
  }
  func.func @transform_1(%arg0: i32) -> (i32, i32) {
    %c0_i32 = arith.constant 0 : i32
    %c0_i32_0 = arith.constant 0 : i32
    return %arg0, %c0_i32 : i32, i32
  }
  func.func @transform_2(%arg0: i32) -> (i32, i32) {
    %c0_i32 = arith.constant 0 : i32
    %c0_i32_0 = arith.constant 0 : i32
    return %arg0, %c0_i32 : i32, i32
  }
}

</mosaic_0001>

<bundles_post_ra>
// kernel: tpu_custom_call.1
= control target key start
LH: loop header
LB: loop body
LE: loop exit
PB: predicated region body
PF: predicated region fallthrough
CT: control target
= control target key end

     0   :  { %7 = vsyncpa [#allocation3], 0  ;;  %s541_s0 = inlined_call_operand.vmem [shape: f32[10,32], index: 0, kind: input, shape index: {}]   ;;  %s542_s1 = inlined_call_operand.vmem [shape: s32[16,1], index: 1, kind: input, shape index: {}]   ;;  %s543_s2 = inlined_call_operand.hbm [shape: f32[16,128], index: 2, kind: output, shape index: {}]  }
   0x1   :  { %9 = vsyncpa [#allocation3 + $0x1], 0  ;;  %s440_s9 = smov 0   ;;  %s442_s10 = smov 0  }
   0x2   :  { %s444_s11 = smov 0   ;;  %s446_s12 = smov 0  }
   0x3 LB: > { %s461_s13 = sadd.s32 4294967295, %s421_s12   ;;  %s302_s14 = sadd.s32 4294967294, %s421_s12   ;;  %s421_s12 = sphi %s446_s12, %s549_s12   ;;  %s417_s11 = sphi %s444_s11, %s548_s11   ;;  %s413_s10 = sphi %s442_s10, %s547_s10   ;;  %s409_s9 = sphi %s440_s9, %s546_s9  }
   0x4   : > { %s465_s15 = sadd.s32 1, %s421_s12   ;;  %s74_s16 = sadd.s32 1, %s417_s11 }
   0x5   : > { %s71_s17 = ssub.s32 %s421_s12, %s465_s15  ;;  %p84_p0 = scmp.ne.s32.totalorder %s417_s11, %s413_s10 }
   0x6   : > { %p72_p1 = scmp.eq.s32.totalorder %s71_s17, 0  ;;  %p85_p2 = scmp.eq.s32.totalorder %s461_s13, 1 }
   0x7   : > { %p90_p3 = scmp.ne.s32.totalorder %s413_s10, %s409_s9  ;;  %p91_p4 = scmp.eq.s32.totalorder %s302_s14, 1 }
   0x8   : > { %s476_s18 = scalar_select %p72_p1, %s417_s11, %s74_s16  }
   0x9   : > { %p478_p5 = por %p85_p2, %p84_p0  ;;  %p482_p6 = por %p91_p4, %p90_p3 }
   0xa   : > { %p305_p7 = scmp.ge.s32.totalorder %s421_s12, 1  ;;  %p123_p8 = scmp.lt.s32.totalorder %s421_s12, 3 }
   0xc   : > { %p124_p9 = pnand %p305_p7, %p123_p8 }
   0xd   : > { %p148_p10 = scmp.lt.s32.totalorder (!%p124_p9), %s461_s13, 1  ;;  %s309_s29 = sshll.u32 (!%p124_p9), %s461_s13, 3 }
   0xe   : > { %127 = sbr.rel (%p124_p9) target bundleno = 566 (0x236), region = 28  ;;  %s145_s30 = sand.u32 (!%p124_p9), 1, %s413_s10  }
   0xf   : > { %s306_s3 = sshll.u32 (!%p124_p9), %s145_s30, 3  ;;  %s311_s6 = sshll.u32 (!%p124_p9), %s461_s13, 7 }
  0x10   : > { %s147_s4 = scalar_lea.vmem (!%p124_p9), [#allocation2], %s306_s3  ;;  %s229_s16 = scalar_lea.hbm (!%p124_p9), %s543_s2, %s311_s6 }
  0x11   : > { %s231_s5 = sshll.u32 (!%p124_p9), %s147_s4, 4  ;;  %s218_s17 = scalar_lea.sflag (!%p124_p9), [#allocation3], %s145_s30  ;;  %s503_s5 = int_to_ptr.vmem [resolvable:$true] %s231_s5 }
  0x13   : > { %v423_v0 = vmov 0   ;;  %s149_s21 = scalar_select %p148_p10, %s461_s13, 1  ;;  %vm158_vm0 = vcmask 261120   ;;  %v165_v7 = vlaneseq  ;;  %v198_v23 = vstv %s309_s29 }
  0x14   : > { %356 = vset.pattern.permute.xlu0 %v423_v0  ;;  %vm204_vm5 = vcmask 7168  }
  0x15   : > { %s307_s22 = sshll.u32 %s149_s21, 3  ;;  %v166_v8 = vand.u32 127, %v165_v7  ;;  %v197_v21 = vshrl.u32 %v165_v7, 7  ;;  %s361_s21 = scalar_lea.vmem %s503_s5, 128 }
  0x16   : > { %s151_s25 = scalar_lea.vmem %s541_s0, %s307_s22  ;;  %s155_s28 = scalar_lea.vmem %s542_s1, %s307_s22 }
  0x17   : > { %v156_v1 = vld [vmem:[%s151_s25] sm:$0xff]  ;;  %v199_v28 = vadd.s32 %v198_v23, %v197_v21  ;;  %p362_p11 = scmp.ne.s32.totalorder %s503_s5, %s361_s21  ;;  %s424_s22 = smov [#allocation2]  }
  0x18   : > { %v159_v2 = vsel %vm158_vm0, %v156_v1, -inf  ;;  %v157_v3 = vld [vmem:[%s155_s28] sm:$0xff]  ;;  %v162_v14 = vsel %vm158_vm0, %v156_v1, 0.0  ;;  %s365_s13 = sshll.u32 %s424_s22, 4  ;;  %s366_s13 = int_to_ptr.vmem [resolvable:$false] %s365_s13 }
  0x19   : > { %160 = vmax.xlane.f32.xlu0 %v159_v2  ;;  %vm201_vm2 = vcmp.ne.s32.totalorder %v157_v3, 0  ;;  %vm200_vm3 = vcmp.lt.s32.totalorder %v199_v28, 10  ;;  %p363_p12 = pnand %p362_p11, %p478_p5  ;;  %s367_s23 = scalar_lea.vmem %s366_s13, 256 }
  0x1a   : > { %vm202_vm4 = vmand %vm200_vm3, %vm201_vm2  ;;  %p368_p0 = scmp.lt.s32.totalorder %s503_s5, %s366_s13  ;;  %p369_p1 = scmp.lt.s32.totalorder %s367_s23, %s361_s21 }
  0x1b   : > { %p364_p13 = pneg %p363_p12 }
  0x1c   : > { %p370_p2 = por %p369_p1, %p368_p0 }
  0x1e   : > { %p371_p3 = pnand %p370_p2, %p364_p13 }
  0x2f   : > { %168 = vperm.xlu0 %356, %v157_v3  }
  0xa2   : > { %v161_v4 = vpop.xlane.xlu0 %160 }
  0xa3   : > { %v175_v5 = vsub.f32 %v156_v1, %v161_v4 }
  0xa5   : > { %v176_v6 = vmul.f32 1.442695, %v175_v5 }
  0xa7   : > { %357 = vpow2.f32 %v176_v6 }
  0xaa   : > { %v169_v9 = vpop.permute.xlu0 %168 }
  0xab   : > { %vm170_vm1 = vcmp.eq.s32.totalorder %v166_v8, %v169_v9 }
  0xac   : > { %v171_v11 = vsel %vm170_vm1, %v156_v1, 0.0 }
  0xad   : > { %v172_v13 = vsel %vm158_vm0, %v171_v11, 0.0 }
  0xb4   : > { %v358_v10 = vpop.eup %357 }
  0xb5   : > { %v178_v12 = vsel %vm158_vm0, %v358_v10, 0.0 }
  0xb6   : > { %179 = vadd.xlane.f32.xlu1 %v178_v12 }
  0xba   : > { %173 = vadd.xlane.f32.xlu1 %v172_v13 }
  0xbe   : > { %163 = vadd.xlane.f32.xlu1 %v162_v14 }
 0x13f   : > { %v180_v15 = vpop.xlane.xlu1 %179 }
 0x140   : > { %359 = vlog2.f32 %v180_v15 }
 0x143   : > { %v174_v17 = vpop.xlane.xlu1 %173 }
 0x144   : > { %v186_v19 = vsub.f32 %v174_v17, %v161_v4 }
 0x147   : > { %v164_v22 = vpop.xlane.xlu1 %163 }
 0x14d   : > { %v360_v16 = vpop.eup %359 }
 0x14e   : > { %v182_v18 = vmul.f32 0.6931472, %v360_v16 }
 0x150   : > { %v183_v20 = vadd.f32 %v182_v18, %v161_v4  ;;  %v187_v24 = vsub.f32 %v186_v19, %v182_v18  ;;  %v188_v27 = vsub.f32 %v175_v5, %v182_v18 }
 0x152   : > { %v184_v25 = vmul.f32 32.0, %v183_v20  ;;  %v190_v29 = vmul.f32 0.89666665, %v187_v24  ;;  %v192_v32 = vmul.f32 0.0033333334, %v188_v27 }
 0x154   : > { %v185_v26 = vsub.f32 %v164_v22, %v184_v25 }
 0x156   : > { %v189_v30 = vmul.f32 0.0033333334, %v185_v26 }
 0x158   : > { %v191_v31 = vadd.f32 %v190_v29, %v189_v30 }
 0x15a   : > { %v193_v33 = vsub.f32 %v191_v31, %v192_v32 }
 0x15c   : > { %v194_v34 = vsub.f32 0.0, %v193_v33 }
 0x15e   : > { %v203_v35 = vsel %vm202_vm4, %v194_v34, 0.0 }
 0x15f   : > { %v205_v36 = vsel %vm204_vm5, %v203_v35, 0.0 }
 0x160   : > { %206 = vadd.xlane.f32.xlu1 %v205_v36 }
 0x1e9   : > { %v207_v37 = vpop.xlane.xlu1 %206 }
 0x1ea   : > { %v208_v38 = vrot.slane %v207_v37, 4 }
 0x1ec   : > { %v209_v39 = vadd.f32 %v208_v38, %v207_v37 }
 0x1ee   : > { %v210_v40 = vrot.slane %v209_v39, 2 }
 0x1f0   : > { %v211_v41 = vadd.f32 %v210_v40, %v209_v39 }
 0x1f2   : > { %v212_v42 = vrot.slane %v211_v41, 1 }
 0x1f4   : > { %v213_v43 = vadd.f32 %v212_v42, %v211_v41 }
 0x1f6   : > { %314 = vpush %v213_v43 }
 0x227   : > { %s315_s7 = spop %314 }
 0x228   : > { %v215_v44 = vstv %s315_s7 }
 0x229   : > { %216 = vst [vmem:[%s147_s4] sm:$0xff] %v215_v44 }
 0x22a   : > { %374 = shalt.err (!%p371_p3)
}
 0x22b   : > { %s375_s24 = scalar_lea.hbm %s229_s16, 128  ;;  %s379_s27 = scalar_lea.hbm %s543_s2, 256 }
 0x22c   : > { %p376_p4 = scmp.ne.s32.totalorder %s229_s16, %s375_s24  ;;  %p380_p9 = scmp.lt.s32.totalorder %s229_s16, %s543_s2 }
 0x22d   : > { %p381_p10 = scmp.lt.s32.totalorder %s379_s27, %s375_s24 }
 0x22e   : > { %p377_p7 = pnand %p376_p4, %p478_p5 }
 0x22f   : > { %p382_p11 = por %p381_p10, %p380_p9 }
 0x230   : > { %p378_p8 = pneg %p377_p7 }
 0x232   : > { %p383_p12 = pnand %p382_p11, %p378_p8 }
 0x234   : > { %386 = shalt.err (!%p383_p12)
}
 0x235   : > { %316 = dma.vmem_to_hbm [thread:$0]  (%p478_p5), %s503_s5, 128, %s229_s16, %s218_s17  }
 0x236 PF: > { %p322_p13 = scmp.ge.s32.totalorder %s421_s12, 2  ;;  %s243_s30 = sand.u32 1, %s409_s9  }
 0x237   : > { %s244_s3 = scalar_lea.sflag [#allocation3], %s243_s30 }
 0x238   : > { %p319_p0 = pnand %p322_p13, %p482_p6 }
 0x23a   : > { %p320_p1 = pneg %p319_p0 }
 0x23c   : > { %404 = dma.done.wait (%p320_p1), %s244_s3, 128  }
 0x23d   : > { %406 = vsyncadd (%p320_p1), %s244_s3, 4294967168  ;;  %p12_p2 = scmp.ge.s32.totalorder %s465_s15, 4   ;;  %s546_s9 = smov %s413_s10 }
 0x23e   : > { %s547_s10 = smov %s417_s11  ;;  %s548_s11 = smov %s476_s18 }
 0x23f   : > { %s549_s12 = smov %s465_s15  ;;  %14 = sbr.rel (!%p12_p2) target bundleno = 3 (0x3), region = 66 }
 0x244   :  { %249 = vsyncpa [#allocation3], 1 }
 0x245   :  { %251 = vsyncpa [#allocation3 + $0x1], 1 }

</bundles_post_ra>
